<compile_context>
chip_gen: v7x
topology: tpu7x:2x2x1
jax: 0.10.0
libtpu: 0.0.40
codegen_flags: <defaults>
</compile_context>

<pallas_src>
import jax
import jax.numpy as jnp
from jax.experimental import pallas as pl
from jax.experimental.pallas import tpu as pltpu


def _round_up(x: int, m: int) -> int:
    return ((x + m - 1) // m) * m


def _fwd_kernel(x_ref, w1_ref, b1_ref, w2_ref, b2_ref, o_ref):
    # x_ref : (TB, T*F)   bf16/f32 -- one row per sequence, time folded into lanes
    # w1_ref: (T*F, T*H)  same dtype as x -- block-diagonal copies of W1
    # b1_ref: (1, T*H)    f32 -- b1 tiled T times
    # w2_ref: (1, T*H)    f32 -- w2 tiled T times, pre-scaled by 1/T (mean fold)
    # b2_ref: (1,)        f32 scalar in SMEM
    # o_ref : (1, TB)     f32 lane-dense probability row for this block

    # One MXU matmul with f32 accumulation: (TB, T*F) @ (T*F, T*H) -> (TB, T*H).
    # Column block t of the result is  x_t @ W1  (block-diagonal W1).
    acts = jnp.dot(x_ref[...], w1_ref[...], preferred_element_type=jnp.float32)
    acts = jnp.maximum(acts + b1_ref[...], 0.0)            # bias + ReLU (VPU)

    # mean_t(relu(...)) . w2  ==  sum over the T*H lanes of acts * (w2/T tiled).
    logits = jnp.sum(acts * w2_ref[...], axis=-1) + b2_ref[0]   # (TB,)

    o_ref[...] = jax.nn.sigmoid(logits).reshape(1, -1)


def eyetracking_forward(x, w1, b1, w2, b2, *, block_rows=2048, cast_bf16=True):
    """Forward pass.  x: (N, T, F) -> (N, 1) probabilities (float32)."""
    n, t, f = x.shape
    hdim = w1.shape[1]
    tf, th = t * f, t * hdim

    # Dtype policy: bf16 storage for x / W1 (halves HBM traffic), f32 math after
    # the matmul.  TODO(synk): store the dataset in bf16 upstream so this cast
    # is not a standalone XLA pass over x.
    in_dtype = jnp.bfloat16 if cast_bf16 else jnp.float32
    if x.dtype != in_dtype:
        x = x.astype(in_dtype)
    x2d = x.reshape(n, tf)                      # free (row-major): lane dim = T*F

    # Host-built block-diagonal W1 (T*F, T*H): block (t, t) = W1.
    w1_block = jnp.kron(jnp.eye(t, dtype=jnp.float32),
                        w1.astype(jnp.float32)).astype(in_dtype)
    b1_row = jnp.tile(b1.reshape(1, hdim).astype(jnp.float32), (1, t))      # (1, T*H)
    w2_row = jnp.tile(w2.reshape(1, hdim).astype(jnp.float32), (1, t)) / t  # (1, T*H)
    b2_s = b2.reshape(1).astype(jnp.float32)                                # SMEM scalar

    # Block of sequences per grid step: multiple of 128 (lane-dense output),
    # large enough to amortize the ~0.35us/step pipeline overhead.
    tb = max(128, min(_round_up(block_rows, 128), _round_up(n, 128)))
    # Keep >= 2 blocks when there is enough work so the parallel grid axis can
    # shard across both TensorCores on v7x (no-op on single-TC v5e/v6e).
    if n > 256 and pl.cdiv(n, tb) < 2:
        tb = max(128, _round_up(pl.cdiv(n, 2), 128))
    n_blocks = pl.cdiv(n, tb)                   # partial last block: no jnp.pad pass
    n_out = n_blocks * tb

    # VMEM budget from (padded) buffer sizes, with headroom; fits v7x's 64 MiB.
    isz = jnp.dtype(in_dtype).itemsize
    vmem_est = (2 * tb * tf * isz           # x block, double-buffered
                + 2 * tf * th * isz         # W1 block (resident)
                + 4 * th * 4                # b1 / w2 rows
                + 2 * tb * 4                # output row, double-buffered
                + tb * th * 4)              # f32 acts intermediate
    vmem_limit = int(min(64 * 1024 * 1024, max(16 * 1024 * 1024, 2 * vmem_est)))

    out = pl.pallas_call(
        _fwd_kernel,
        out_shape=jax.ShapeDtypeStruct((1, n_out), jnp.float32),
        grid=(n_blocks,),
        in_specs=[
            pl.BlockSpec((tb, tf), lambda i: (i, 0)),      # x rows for this block
            pl.BlockSpec((tf, th), lambda i: (0, 0)),      # W1 block-diag (resident)
            pl.BlockSpec((1, th), lambda i: (0, 0)),       # b1 tiled
            pl.BlockSpec((1, th), lambda i: (0, 0)),       # w2 tiled / T
            pl.BlockSpec(memory_space=pltpu.MemorySpace.SMEM),  # b2 scalar
        ],
        out_specs=pl.BlockSpec((1, tb), lambda i: (0, i)),  # lane-dense output row
        compiler_params=pltpu.CompilerParams(
            dimension_semantics=("parallel",),
            vmem_limit_bytes=vmem_limit,
        ),
    )(x2d, w1_block, b1_row, w2_row, b2_s)

    return out.reshape(n_out, 1)[:n]


def predict_subj_mean(X, w1, b1, w2, b2, **kw):
    """Mirror of `_predict(X, subj_mean=True)`.

    X: (B, S, T, F). Runs the kernel on the flattened (B*S, T, F) input and
    averages predictions over sentences with at least one nonzero entry.
    """
    b, s, t, f = X.shape
    x_flat = X.reshape(b * s, t, f)
    y_flat = eyetracking_forward(x_flat, w1, b1, w2, b2, **kw)          # (B*S, 1)
    y = y_flat.reshape(b, s)
    mask = (jnp.count_nonzero(X, axis=(2, 3)) > 0).astype(jnp.float32)  # (B, S)
    denom = jnp.maximum(jnp.sum(mask, axis=1), 1.0)     # guard all-empty batch elems
    return jnp.sum(y * mask, axis=1) / denom                            # (B,)


def _reference_forward(x, w1, b1, w2, b2, cast_bf16=True):
    """Pure-JAX reference with the same dtype policy as the kernel."""
    if cast_bf16:
        x = x.astype(jnp.bfloat16)
        w1 = w1.astype(jnp.bfloat16)
    h = jnp.einsum("ntf,fh->nth", x, w1, preferred_element_type=jnp.float32)
    h = jnp.maximum(h + b1.reshape(1, 1, -1).astype(jnp.float32), 0.0)
    pooled = jnp.mean(h, axis=1)
    logit = pooled @ w2.astype(jnp.float32) + b2.astype(jnp.float32)
    return jax.nn.sigmoid(logit)


if __name__ == "__main__":
    # Small shapes consistent with the module's data contract:
    #   B=2 batch elements, S=4 sentences each, T=8 tokens, F=16 features, H=32
    B, S, T, F, H = 2, 4, 8, 16, 32

    key = jax.random.PRNGKey(0)
    kx, k1, k2, k3, k4 = jax.random.split(key, 5)

    X = jax.random.normal(kx, (B, S, T, F), dtype=jnp.float32)
    # Zero out one sentence to exercise the "skip empty sentences" path.
    X = X.at[0, 3].set(0.0)

    w1 = jax.random.normal(k1, (F, H), dtype=jnp.float32) * 0.1
    b1 = jax.random.normal(k2, (1, H), dtype=jnp.float32) * 0.01
    w2 = jax.random.normal(k3, (H, 1), dtype=jnp.float32) * 0.1
    b2 = jax.random.normal(k4, (1, 1), dtype=jnp.float32) * 0.01

    # Plain forward on the flattened input (what forward() itself computes).
    x_flat = X.reshape(B * S, T, F)
    y_kernel = eyetracking_forward(x_flat, w1, b1, w2, b2)
    jax.block_until_ready(y_kernel)

    # Subject-mean prediction path (_predict with subj_mean=True).
    y_subj = predict_subj_mean(X, w1, b1, w2, b2)
    jax.block_until_ready(y_subj)

    # Silent correctness check against a pure-JAX reference (same dtype policy).
    y_ref = _reference_forward(x_flat, w1, b1, w2, b2)
    assert y_kernel.shape == (B * S, 1) and y_subj.shape == (B,)
    assert jnp.allclose(y_kernel, y_ref, atol=2e-3, rtol=2e-3)
    assert bool(jnp.all(jnp.isfinite(y_subj)))

    # TODO(synk): training loops, Adam optimizer, per-subject sklearn metrics,
    # and DataLoader plumbing from the PyTorch class are host-side logic, not
    # kernel material.

    print("KERNEL_OK")
</pallas_src>

<mosaic_0001>
module attributes {stable_mosaic.version = 11 : i64} {
  func.func @_fwd_kernel(%arg0: i32, %arg1: memref<128x128xbf16, #tpu.memory_space<vmem>>, %arg2: memref<128x256xbf16, #tpu.memory_space<vmem>>, %arg3: memref<1x256xf32, #tpu.memory_space<vmem>>, %arg4: memref<1x256xf32, #tpu.memory_space<vmem>>, %arg5: memref<1xf32, #tpu.memory_space<smem>>, %arg6: memref<1x128xf32, #tpu.memory_space<vmem>>) attributes {dimension_semantics = [#tpu.dimension_semantics<parallel>], iteration_bounds = array<i64: 1>, scalar_prefetch = 0 : i64, scratch_operands = 0 : i64, tpu.core_type = #tpu.core_type<tc>, window_params = [{transform_indices = @transform_0, window_bounds = array<i64: 128, 128>}, {pipeline_mode = #tpu.pipeline_mode<synchronous>, transform_indices = @transform_1, window_bounds = array<i64: 128, 256>}, {pipeline_mode = #tpu.pipeline_mode<synchronous>, transform_indices = @transform_2, window_bounds = array<i64: 1, 256>}, {pipeline_mode = #tpu.pipeline_mode<synchronous>, transform_indices = @transform_3, window_bounds = array<i64: 1, 256>}, {transform_indices = @transform_4, window_bounds = array<i64: 1>}, {transform_indices = @transform_5, window_bounds = array<i64: 1, 128>}]} {
    %c0 = arith.constant 0 : index
    %c0_0 = arith.constant 0 : index
    %0 = vector.load %arg1[%c0, %c0_0] : memref<128x128xbf16, #tpu.memory_space<vmem>>, vector<128x128xbf16>
    %c0_1 = arith.constant 0 : index
    %c0_2 = arith.constant 0 : index
    %1 = vector.load %arg2[%c0_1, %c0_2] : memref<128x256xbf16, #tpu.memory_space<vmem>>, vector<128x256xbf16>
    %cst = arith.constant dense<0.000000e+00> : vector<128x256xf32>
    %2 = tpu.matmul %0, %1, %cst {dimension_numbers = #tpu.dot_dimension_numbers<[1], [0], [0], [1], [0, 0, 1, 1], [], []>} : vector<128x128xbf16>, vector<128x256xbf16>, vector<128x256xf32> -> vector<128x256xf32>
    %c0_3 = arith.constant 0 : index
    %c0_4 = arith.constant 0 : index
    %3 = vector.load %arg3[%c0_3, %c0_4] : memref<1x256xf32, #tpu.memory_space<vmem>>, vector<1x256xf32>
    %4 = vector.broadcast %3 : vector<1x256xf32> to vector<128x256xf32>
    %5 = arith.addf %2, %4 : vector<128x256xf32>
    %cst_5 = arith.constant 0.000000e+00 : f32
    %6 = vector.broadcast %cst_5 : f32 to vector<128x256xf32>
    %7 = arith.maximumf %5, %6 : vector<128x256xf32>
    %c0_6 = arith.constant 0 : index
    %c0_7 = arith.constant 0 : index
    %8 = vector.load %arg4[%c0_6, %c0_7] : memref<1x256xf32, #tpu.memory_space<vmem>>, vector<1x256xf32>
    %9 = vector.broadcast %8 : vector<1x256xf32> to vector<128x256xf32>
    %10 = arith.mulf %7, %9 : vector<128x256xf32>
    %cst_8 = arith.constant dense<0.000000e+00> : vector<128xf32>
    %11 = vector.multi_reduction <add>, %10, %cst_8 [1] : vector<128x256xf32> to vector<128xf32>
    %c0_9 = arith.constant 0 : index
    %12 = memref.load %arg5[%c0_9] : memref<1xf32, #tpu.memory_space<smem>>
    %13 = vector.broadcast %12 : f32 to vector<128xf32>
    %14 = arith.addf %11, %13 : vector<128xf32>
    %15 = arith.negf %14 : vector<128xf32>
    %16 = math.exp %15 : vector<128xf32>
    %cst_10 = arith.constant 1.000000e+00 : f32
    %17 = vector.broadcast %cst_10 : f32 to vector<128xf32>
    %18 = arith.addf %17, %16 : vector<128xf32>
    %19 = arith.divf %17, %18 : vector<128xf32>
    %20 = vector.shape_cast %19 : vector<128xf32> to vector<1x128xf32>
    %c0_11 = arith.constant 0 : index
    %c0_12 = arith.constant 0 : index
    %21 = vector.load %arg6[%c0_11, %c0_12] : memref<1x128xf32, #tpu.memory_space<vmem>>, vector<1x128xf32>
    tpu.vector_store %arg6[%c0_11, %c0_12], %20 {strides = array<i32>} : memref<1x128xf32, #tpu.memory_space<vmem>>, vector<1x128xf32>,
    return
  }
  func.func @transform_0(%arg0: i32) -> (i32, i32) {
    %c0_i32 = arith.constant 0 : i32
    %c0_i32_0 = arith.constant 0 : i32
    return %arg0, %c0_i32 : i32, i32
  }
  func.func @transform_1(%arg0: i32) -> (i32, i32) {
    %c0_i32 = arith.constant 0 : i32
    %c0_i32_0 = arith.constant 0 : i32
    %c0_i32_1 = arith.constant 0 : i32
    return %c0_i32, %c0_i32_0 : i32, i32
  }
  func.func @transform_2(%arg0: i32) -> (i32, i32) {
    %c0_i32 = arith.constant 0 : i32
    %c0_i32_0 = arith.constant 0 : i32
    %c0_i32_1 = arith.constant 0 : i32
    return %c0_i32, %c0_i32_0 : i32, i32
  }
  func.func @transform_3(%arg0: i32) -> (i32, i32) {
    %c0_i32 = arith.constant 0 : i32
    %c0_i32_0 = arith.constant 0 : i32
    %c0_i32_1 = arith.constant 0 : i32
    return %c0_i32, %c0_i32_0 : i32, i32
  }
  func.func @transform_4(%arg0: i32) -> i32 {
    %c0_i32 = arith.constant 0 : i32
    %c0_i32_0 = arith.constant 0 : i32
    return %c0_i32 : i32
  }
  func.func @transform_5(%arg0: i32) -> (i32, i32) {
    %c0_i32 = arith.constant 0 : i32
    %c0_i32_0 = arith.constant 0 : i32
    return %c0_i32, %arg0 : i32, i32
  }
}

</mosaic_0001>

<bundles_post_ra>
// kernel: tpu_custom_call.1
= control target key start
LH: loop header
LB: loop body
LE: loop exit
PB: predicated region body
PF: predicated region fallthrough
CT: control target
= control target key end

     0   :  { %11 = vsyncpa [#allocation4], 0  ;;  %s1185_s0 = inlined_call_operand.hbm [shape: bf16[8,128], index: 0, kind: input, shape index: {}]   ;;  %s1186_s1 = inlined_call_operand.hbm [shape: bf16[128,256], index: 1, kind: input, shape index: {}]   ;;  %s1187_s2 = inlined_call_operand.vmem [shape: f32[1,256], index: 2, kind: input, shape index: {}]   ;;  %s1188_s3 = inlined_call_operand.vmem [shape: f32[1,256], index: 3, kind: input, shape index: {}]   ;;  %s1189_s4 = inlined_call_operand.<no memory space> [shape: f32[1], index: 4, kind: input, shape index: {}]   ;;  %s1190_s5 = inlined_call_operand.hbm [shape: f32[1,128], index: 5, kind: output, shape index: {}]  }
   0x1   :  { %12 = vsyncpa [#allocation7], 0 }
   0x2   :  { %13 = vsyncpa [#allocation5], 0 }
   0x3   :  { %18 = vsyncadd [#allocation4], 960  ;;  %s951_s18 = smov [#allocation3]   ;;  %s879_s22 = scalar_lea.hbm %s1185_s0, 64 }
   0x4   :  { %s19_s19 = sshll.u32 %s951_s18, 4  ;;  %p880_p0 = scmp.ne.s32.totalorder %s1185_s0, %s879_s22  ;;  %s20_s19 = int_to_ptr.vmem [resolvable:$true] %s19_s19 }
   0x5   :  { %p883_p1 = scmp.lt.u32.totalorder %s879_s22, %s1185_s0 }
   0x7   :  { %p885_p2 = pnand %p883_p1, %p880_p0 }
   0x9   :  { %888 = shalt.err (!%p885_p2)
}
   0xa   :  { %s889_s27 = scalar_lea.vmem %s20_s19, 64  ;;  %s893_s28 = scalar_lea.vmem %s20_s19, 1024 }
   0xb   :  { %p890_p3 = scmp.ne.s32.totalorder %s20_s19, %s889_s27  ;;  %p894_p4 = scmp.lt.s32.totalorder %s20_s19, %s20_s19 }
   0xc   :  { %p895_p5 = scmp.lt.s32.totalorder %s893_s28, %s889_s27 }
   0xe   :  { %p896_p6 = por %p895_p5, %p894_p4 }
  0x10   :  { %p897_p7 = pnand %p896_p6, %p890_p3 }
  0x12   :  { %900 = shalt.err (!%p897_p7)
}
  0x13   :  { %s952_s29 = smov 64   ;;  %s953_s30 = smov 4  }
  0x14   :  { %25 = dma.hbm_to_vmem [thread:$0]  %s1185_s0, 64, %s20_s19, [#allocation4], %s952_s29, %s952_s29, %s953_s30  }
  0x15   :  { %s954_s8 = smov [#allocation6]   ;;  %s901_s12 = scalar_lea.hbm %s1186_s1, 2048 }
  0x16   :  { %s31_s9 = sshll.u32 %s954_s8, 4  ;;  %p902_p8 = scmp.ne.s32.totalorder %s1186_s1, %s901_s12  ;;  %s32_s9 = int_to_ptr.vmem [resolvable:$true] %s31_s9 }
  0x17   :  { %p905_p9 = scmp.lt.u32.totalorder %s901_s12, %s1186_s1 }
  0x19   :  { %p907_p10 = pnand %p905_p9, %p902_p8 }
  0x1b   :  { %910 = shalt.err (!%p907_p10)
}
  0x1c   :  { %s911_s17 = scalar_lea.vmem %s32_s9, 2048  ;;  %p916_p12 = scmp.lt.s32.totalorder %s32_s9, %s32_s9 }
  0x1d   :  { %p912_p11 = scmp.ne.s32.totalorder %s32_s9, %s911_s17  ;;  %p917_p13 = scmp.lt.s32.totalorder %s911_s17, %s911_s17 }
  0x1f   :  { %p918_p0 = por %p917_p13, %p916_p12 }
  0x21   :  { %p919_p1 = pnand %p918_p0, %p912_p11 }
  0x23   :  { %922 = shalt.err (!%p919_p1)
}
  0x24   :  { %s955_s0 = smov 128   ;;  %s956_s18 = smov 8  }
  0x25   :  { %37 = dma.hbm_to_vmem [thread:$0]  %s1186_s1, 2048, %s32_s9, [#allocation7], %s955_s0, %s955_s0, %s956_s18  }
  0x26   :  { %945 = dma.done.wait [#allocation4], 1024  }
  0x27   :  { %946 = vsyncadd [#allocation4], 4294966272 }
  0x28   :  { %947 = dma.done.wait [#allocation7], 2048  }
  0x29   :  { %948 = vsyncadd [#allocation7], 4294965248  ;;  %v957_v0 = vmov 0   ;;  %v783_v1 = vld [vmem:[#allocation6 + $0x4] ss:$8 sps:$4 sm:$0xff]   ;;  %v811_v21 = vld [vmem:[#allocation3 + $0x10] sm:$0xff]   ;;  %v85_v25 = vlaneseq }
  0x2a   :  { %255 = vmatprep.mubr.bf16.mxu0 %v957_v0  ;;  %295 = vmatprep.mubr.bf16.mxu1 %v957_v0  ;;  %v785_v2 = vld [vmem:[#allocation6] ss:$8 sps:$4 sm:$0xff]   ;;  %v786_v3 = vld [vmem:[#allocation6 + $0x14] ss:$8 sps:$4 sm:$0xff]   ;;  %v788_v4 = vld [vmem:[#allocation6 + $0x10] ss:$8 sps:$4 sm:$0xff]  }
  0x2b   :  { %223 = vmatprep.subr.bf16.mxu0 %v783_v1  ;;  %759 = vmatprep.subr.bf16.mxu1 %v783_v1  ;;  %v789_v5 = vld [vmem:[#allocation6 + $0x24] ss:$8 sps:$4 sm:$0xff]   ;;  %v791_v6 = vld [vmem:[#allocation6 + $0x20] ss:$8 sps:$4 sm:$0xff]   ;;  %v792_v7 = vld [vmem:[#allocation6 + $0x34] ss:$8 sps:$4 sm:$0xff]  }
  0x2c   :  { %224 = vmatpush1.bf16.msra.mxu0 %v785_v2  ;;  %767 = vmatpush1.bf16.msra.mxu1 %v785_v2  ;;  %v794_v8 = vld [vmem:[#allocation6 + $0x30] ss:$8 sps:$4 sm:$0xff]   ;;  %v795_v9 = vld [vmem:[#allocation6 + $0x44] ss:$8 sps:$4 sm:$0xff]   ;;  %v797_v10 = vld [vmem:[#allocation6 + $0x40] ss:$8 sps:$4 sm:$0xff]  }
  0x2d   :  { %225 = vmatprep.subr.bf16.mxu0 %v786_v3  ;;  %760 = vmatprep.subr.bf16.mxu1 %v786_v3  ;;  %v798_v11 = vld [vmem:[#allocation6 + $0x54] ss:$8 sps:$4 sm:$0xff]   ;;  %v800_v12 = vld [vmem:[#allocation6 + $0x50] ss:$8 sps:$4 sm:$0xff]   ;;  %v801_v13 = vld [vmem:[#allocation6 + $0x64] ss:$8 sps:$4 sm:$0xff]  }
  0x2e   :  { %v803_v14 = vld [vmem:[#allocation6 + $0x60] ss:$8 sps:$4 sm:$0xff]   ;;  %v804_v15 = vld [vmem:[#allocation6 + $0x74] ss:$8 sps:$4 sm:$0xff]   ;;  %v806_v16 = vld [vmem:[#allocation6 + $0x70] ss:$8 sps:$4 sm:$0xff]  }
  0x2f   :  { %v807_v17 = vld [vmem:[#allocation3] sm:$0xff]   ;;  %v809_v19 = vld [vmem:[#allocation3 + $0x8] sm:$0xff]   ;;  %v812_v22 = vld [vmem:[#allocation3 + $0x30] sm:$0xff]   ;;  %v1022_v26 = vshrl.u32 %v85_v25, 7  ;;  %vm601_vm0 = vcmask 130112   ;;  %vm608_vm1 = vcmask 195712  }
  0x30   :  { %226 = vmatpush1.bf16.msra.mxu0 %v788_v4  ;;  %768 = vmatpush1.bf16.msra.mxu1 %v788_v4  ;;  %v808_v18 = vld [vmem:[#allocation3 + $0x20] sm:$0xff]   ;;  %v810_v20 = vld [vmem:[#allocation3 + $0x28] sm:$0xff]   ;;  %v813_v23 = vld [vmem:[#allocation3 + $0x18] sm:$0xff]   ;;  %vm615_vm2 = vcmask 261312   ;;  %vm622_vm3 = vcmask 326912   ;;  %vm629_vm4 = vcmask 392512  }
  0x31   :  { %227 = vmatprep.subr.bf16.mxu0 %v789_v5  ;;  %761 = vmatprep.subr.bf16.mxu1 %v789_v5  ;;  %v814_v24 = vld [vmem:[#allocation3 + $0x38] sm:$0xff]   ;;  %v87_v27 = vsub.s32 0, %v1022_v26  ;;  %v83_v28 = vld [vmem:[%s1187_s2] sm:$0x3]  ;;  %v91_v29 = vsub.s32 1, %v1022_v26  ;;  %vm636_vm5 = vcmask 458112  }
  0x32   :  { %v368_v32 = vld [vmem:[%s1188_s3] sm:$0x3]  ;;  %vm643_vm6 = vcmask 523712   ;;  %vm650_vm7 = vcmask 589312   ;;  %vm657_vm8 = vcmask 654912   ;;  %vm664_vm9 = vcmask 720512  }
  0x33   :  { %v1029_v30 = vrot.slane %v83_v28, %v87_v27  ;;  %v1031_v31 = vrot.slane %v83_v28, %v91_v29  ;;  %v1038_v38 = vrot.slane %v368_v32, %v87_v27  ;;  %v1042_v43 = vrot.slane %v368_v32, %v91_v29 }
  0x34   :  { %228 = vmatpush1.bf16.msra.mxu0 %v791_v6  ;;  %769 = vmatpush1.bf16.msra.mxu1 %v791_v6  ;;  %vm671_vm10 = vcmask 786112   ;;  %vm678_vm11 = vcmask 851712   ;;  %vm685_vm12 = vcmask 917312   ;;  %vm692_vm13 = vcmask 982912  }
  0x35   :  { %229 = vmatprep.subr.bf16.mxu0 %v792_v7  ;;  %762 = vmatprep.subr.bf16.mxu1 %v792_v7  ;;  %vm699_vm14 = vcmask 1048512  }
  0x38   :  { %230 = vmatpush1.bf16.msra.mxu0 %v794_v8  ;;  %770 = vmatpush1.bf16.msra.mxu1 %v794_v8 }
  0x39   :  { %231 = vmatprep.subr.bf16.mxu0 %v795_v9  ;;  %763 = vmatprep.subr.bf16.mxu1 %v795_v9 }
  0x3c   :  { %232 = vmatpush1.bf16.msra.mxu0 %v797_v10  ;;  %771 = vmatpush1.bf16.msra.mxu1 %v797_v10 }
  0x3d   :  { %233 = vmatprep.subr.bf16.mxu0 %v798_v11  ;;  %764 = vmatprep.subr.bf16.mxu1 %v798_v11 }
  0x40   :  { %234 = vmatpush1.bf16.msra.mxu0 %v800_v12  ;;  %772 = vmatpush1.bf16.msra.mxu1 %v800_v12 }
  0x41   :  { %235 = vmatprep.subr.bf16.mxu0 %v801_v13  ;;  %765 = vmatprep.subr.bf16.mxu1 %v801_v13 }
  0x44   :  { %236 = vmatpush1.bf16.msra.mxu0 %v803_v14  ;;  %773 = vmatpush1.bf16.msra.mxu1 %v803_v14 }
  0x45   :  { %237 = vmatprep.subr.bf16.mxu0 %v804_v15  ;;  %766 = vmatprep.subr.bf16.mxu1 %v804_v15 }
  0x48   :  { %238 = vmatpush1.bf16.msra.mxu0 %v806_v16  ;;  %774 = vmatpush1.bf16.msra.mxu1 %v806_v16 }
  0x4b   :  { %256 = vmatmul.mubr.bf16.vlgmr.msra.gmra.mrb[0].mxu0 %v807_v17  ;;  %296 = vmatmul.mubr.bf16.vlgmr.msra.gmra.mrb[0].mxu1 %v808_v18 }
  0x4c   :  { %265 = vmatprep.mubr.bf16.mxu0 %v957_v0  ;;  %305 = vmatprep.mubr.bf16.mxu1 %v957_v0 }
  0x53   :  { %266 = vmatmul.mubr.bf16.gmra.mrb[4].mxu0 %v809_v19  ;;  %306 = vmatmul.mubr.bf16.gmra.mrb[4].mxu1 %v810_v20 }
  0x54   :  { %275 = vmatprep.mubr.bf16.mxu0 %v957_v0  ;;  %315 = vmatprep.mubr.bf16.mxu1 %v957_v0 }
  0x5b   :  { %276 = vmatmul.mubr.bf16.gmra.mrb[8].mxu0 %v811_v21  ;;  %316 = vmatmul.mubr.bf16.gmra.mrb[8].mxu1 %v812_v22 }
  0x5c   :  { %285 = vmatprep.mubr.bf16.mxu0 %v957_v0  ;;  %325 = vmatprep.mubr.bf16.mxu1 %v957_v0 }
  0x63   :  { %286 = vmatmul.mubr.bf16.gmra.mrb[12].mxu0 %v813_v23  ;;  %326 = vmatmul.mubr.bf16.gmra.mrb[12].mxu1 %v814_v24 }
 0x11e   :  { %v257_v33 = vpop.f32.mrb[0].mxu0  ;;  %v297_v34 = vpop.f32.mrb[0].mxu1 }
 0x11f   :  { %v258_v35 = vadd.f32 %v257_v33, %v1029_v30  ;;  %v259_v36 = vpop.f32.mrb[1].mxu0  ;;  %v298_v37 = vadd.f32 %v297_v34, %v1029_v30  ;;  %v299_v39 = vpop.f32.mrb[1].mxu1 }
 0x120   :  { %v260_v40 = vadd.f32 %v259_v36, %v1031_v31  ;;  %v261_v41 = vpop.f32.mrb[2].mxu0  ;;  %v300_v42 = vadd.f32 %v299_v39, %v1031_v31  ;;  %v301_v44 = vpop.f32.mrb[2].mxu1 }
 0x121   :  { %v336_v45 = vmax.f32 %v258_v35, 0.0  ;;  %v352_v46 = vmax.f32 %v298_v37, 0.0  ;;  %v262_v47 = vadd.f32 %v261_v41, %v1029_v30  ;;  %v263_v48 = vpop.f32.mrb[3].mxu0  ;;  %v302_v49 = vadd.f32 %v301_v44, %v1029_v30  ;;  %v303_v50 = vpop.f32.mrb[3].mxu1 }
 0x122   :  { %v337_v51 = vmax.f32 %v260_v40, 0.0  ;;  %v353_v52 = vmax.f32 %v300_v42, 0.0  ;;  %v264_v53 = vadd.f32 %v263_v48, %v1031_v31  ;;  %v304_v54 = vadd.f32 %v303_v50, %v1031_v31 }
 0x123   :  { %v396_v55 = vmul.f32 %v1038_v38, %v352_v46  ;;  %v338_v56 = vmax.f32 %v262_v47, 0.0  ;;  %v354_v57 = vmax.f32 %v302_v49, 0.0  ;;  %v380_v58 = vmul.f32 %v1038_v38, %v336_v45 }
 0x124   :  { %v397_v59 = vmul.f32 %v1042_v43, %v353_v52  ;;  %v339_v60 = vmax.f32 %v264_v53, 0.0  ;;  %v355_v61 = vmax.f32 %v304_v54, 0.0  ;;  %v381_v62 = vmul.f32 %v1042_v43, %v337_v51 }
 0x125   :  { %v382_v63 = vmul.f32 %v1038_v38, %v338_v56  ;;  %v398_v0 = vmul.f32 %v1038_v38, %v354_v57 }
 0x126   :  { %v383_v1 = vmul.f32 %v1042_v43, %v339_v60  ;;  %v267_v2 = vpop.f32.mrb[4].mxu0  ;;  %v412_v3 = vadd.f32 %v381_v62, %v380_v58  ;;  %v307_v4 = vpop.f32.mrb[4].mxu1  ;;  %v399_v5 = vmul.f32 %v1042_v43, %v355_v61  ;;  %v436_v6 = vadd.f32 %v397_v59, %v396_v55 }
 0x127   :  { %v268_v7 = vadd.f32 %v267_v2, %v1029_v30  ;;  %v269_v8 = vpop.f32.mrb[5].mxu0  ;;  %v308_v9 = vadd.f32 %v307_v4, %v1029_v30  ;;  %v309_v10 = vpop.f32.mrb[5].mxu1 }
 0x128   :  { %v270_v11 = vadd.f32 %v269_v8, %v1031_v31  ;;  %v271_v12 = vpop.f32.mrb[6].mxu0  ;;  %413 = vadd.xlane.f32.xlu0 %v412_v3  ;;  %v310_v13 = vadd.f32 %v309_v10, %v1031_v31  ;;  %v439_v14 = vadd.f32 %v399_v5, %v398_v0  ;;  %v311_v15 = vpop.f32.mrb[6].mxu1  ;;  %v415_v16 = vadd.f32 %v383_v1, %v382_v63 }
 0x129   :  { %v340_v17 = vmax.f32 %v268_v7, 0.0  ;;  %v272_v18 = vadd.f32 %v271_v12, %v1029_v30  ;;  %v273_v19 = vpop.f32.mrb[7].mxu0  ;;  %v356_v20 = vmax.f32 %v308_v9, 0.0  ;;  %v312_v21 = vadd.f32 %v311_v15, %v1029_v30  ;;  %v313_v22 = vpop.f32.mrb[7].mxu1 }
 0x12a   :  { %v341_v23 = vmax.f32 %v270_v11, 0.0  ;;  %v274_v24 = vadd.f32 %v273_v19, %v1031_v31  ;;  %v357_v27 = vmax.f32 %v310_v13, 0.0  ;;  %440 = vadd.xlane.f32.xlu1 %v439_v14  ;;  %v314_v28 = vadd.f32 %v313_v22, %v1031_v31 }
 0x12b   :  { %v384_v29 = vmul.f32 %v1038_v38, %v340_v17  ;;  %v342_v32 = vmax.f32 %v272_v18, 0.0  ;;  %v400_v33 = vmul.f32 %v1038_v38, %v356_v20  ;;  %v358_v34 = vmax.f32 %v312_v21, 0.0 }
 0x12c   :  { %v385_v35 = vmul.f32 %v1042_v43, %v341_v23  ;;  %v343_v36 = vmax.f32 %v274_v24, 0.0  ;;  %v401_v37 = vmul.f32 %v1042_v43, %v357_v27  ;;  %437 = vadd.xlane.f32.xlu0 %v436_v6  ;;  %v359_v39 = vmax.f32 %v314_v28, 0.0 }
 0x12d   :  { %v386_v40 = vmul.f32 %v1038_v38, %v342_v32  ;;  %v402_v47 = vmul.f32 %v1038_v38, %v358_v34 }
 0x12e   :  { %v387_v41 = vmul.f32 %v1042_v43, %v343_v36  ;;  %v277_v42 = vpop.f32.mrb[8].mxu0  ;;  %v418_v44 = vadd.f32 %v385_v35, %v384_v29  ;;  %v317_v45 = vpop.f32.mrb[8].mxu1  ;;  %v442_v46 = vadd.f32 %v401_v37, %v400_v33  ;;  %v403_v49 = vmul.f32 %v1042_v43, %v359_v39 }
 0x12f   :  { %v278_v48 = vadd.f32 %v277_v42, %v1029_v30  ;;  %v279_v50 = vpop.f32.mrb[9].mxu0  ;;  %v318_v51 = vadd.f32 %v317_v45, %v1029_v30  ;;  %v319_v52 = vpop.f32.mrb[9].mxu1 }
 0x130   :  { %v280_v53 = vadd.f32 %v279_v50, %v1031_v31  ;;  %v281_v54 = vpop.f32.mrb[10].mxu0  ;;  %419 = vadd.xlane.f32.xlu1 %v418_v44  ;;  %416 = vadd.xlane.f32.xlu0 %v415_v16  ;;  %v320_v55 = vadd.f32 %v319_v52, %v1031_v31  ;;  %v421_v56 = vadd.f32 %v387_v41, %v386_v40  ;;  %v321_v57 = vpop.f32.mrb[10].mxu1 }
 0x131   :  { %v344_v58 = vmax.f32 %v278_v48, 0.0  ;;  %v282_v59 = vadd.f32 %v281_v54, %v1029_v30  ;;  %v283_v60 = vpop.f32.mrb[11].mxu0  ;;  %v360_v61 = vmax.f32 %v318_v51, 0.0  ;;  %v322_v62 = vadd.f32 %v321_v57, %v1029_v30  ;;  %v323_v63 = vpop.f32.mrb[11].mxu1 }
 0x132   :  { %v345_v0 = vmax.f32 %v280_v53, 0.0  ;;  %v284_v1 = vadd.f32 %v283_v60, %v1031_v31  ;;  %v361_v2 = vmax.f32 %v320_v55, 0.0  ;;  %v324_v3 = vadd.f32 %v323_v63, %v1031_v31 }
 0x133   :  { %v388_v4 = vmul.f32 %v1038_v38, %v344_v58  ;;  %v346_v5 = vmax.f32 %v282_v59, 0.0  ;;  %v404_v6 = vmul.f32 %v1038_v38, %v360_v61  ;;  %v362_v7 = vmax.f32 %v322_v62, 0.0 }
 0x134   :  { %v389_v8 = vmul.f32 %v1042_v43, %v345_v0  ;;  %v347_v9 = vmax.f32 %v284_v1, 0.0  ;;  %v405_v10 = vmul.f32 %v1042_v43, %v361_v2  ;;  %422 = vadd.xlane.f32.xlu1 %v421_v56  ;;  %443 = vadd.xlane.f32.xlu0 %v442_v46  ;;  %v363_v11 = vmax.f32 %v324_v3, 0.0 }
 0x135   :  { %v390_v12 = vmul.f32 %v1038_v38, %v346_v5  ;;  %v445_v13 = vadd.f32 %v403_v49, %v402_v47  ;;  %v406_v19 = vmul.f32 %v1038_v38, %v362_v7  ;;  %v1107_v61 = vstv %s1189_s4  ;;  %s958_s4 = smov [#allocation8]  }
 0x136   :  { %v391_v14 = vmul.f32 %v1042_v43, %v347_v9  ;;  %v287_v15 = vpop.f32.mrb[12].mxu0  ;;  %v424_v16 = vadd.f32 %v389_v8, %v388_v4  ;;  %v327_v17 = vpop.f32.mrb[12].mxu1  ;;  %v448_v18 = vadd.f32 %v405_v10, %v404_v6  ;;  %v407_v21 = vmul.f32 %v1042_v43, %v363_v11  ;;  %s709_s24 = sshll.u32 %s958_s4, 4  ;;  %s710_s24 = int_to_ptr.vmem [resolvable:$true] %s709_s24 }
 0x137   :  { %v288_v20 = vadd.f32 %v287_v15, %v1029_v30  ;;  %v289_v22 = vpop.f32.mrb[13].mxu0  ;;  %v328_v23 = vadd.f32 %v327_v17, %v1029_v30  ;;  %v329_v24 = vpop.f32.mrb[13].mxu1  ;;  %s923_s25 = scalar_lea.vmem %s710_s24, 16  ;;  %s927_s26 = scalar_lea.vmem %s710_s24, 32 }
 0x138   :  { %v290_v27 = vadd.f32 %v289_v22, %v1031_v31  ;;  %v291_v28 = vpop.f32.mrb[14].mxu0  ;;  %446 = vadd.xlane.f32.xlu1 %v445_v13  ;;  %425 = vadd.xlane.f32.xlu0 %v424_v16  ;;  %v330_v29 = vadd.f32 %v329_v24, %v1031_v31  ;;  %v427_v32 = vadd.f32 %v391_v14, %v390_v12  ;;  %v331_v33 = vpop.f32.mrb[14].mxu1  ;;  %p924_p2 = scmp.ne.s32.totalorder %s710_s24, %s923_s25  ;;  %p928_p3 = scmp.lt.s32.totalorder %s710_s24, %s710_s24 }
 0x139   :  { %v348_v34 = vmax.f32 %v288_v20, 0.0  ;;  %v292_v35 = vadd.f32 %v291_v28, %v1029_v30  ;;  %v293_v36 = vpop.f32.mrb[15].mxu0  ;;  %v364_v37 = vmax.f32 %v328_v23, 0.0  ;;  %v332_v39 = vadd.f32 %v331_v33, %v1029_v30  ;;  %v333_v40 = vpop.f32.mrb[15].mxu1  ;;  %p929_p4 = scmp.lt.s32.totalorder %s927_s26, %s923_s25 }
 0x13a   :  { %v349_v41 = vmax.f32 %v290_v27, 0.0  ;;  %v294_v42 = vadd.f32 %v293_v36, %v1031_v31  ;;  %v365_v44 = vmax.f32 %v330_v29, 0.0  ;;  %v334_v45 = vadd.f32 %v333_v40, %v1031_v31 }
 0x13b   :  { %v392_v46 = vmul.f32 %v1038_v38, %v348_v34  ;;  %v350_v47 = vmax.f32 %v292_v35, 0.0  ;;  %v408_v48 = vmul.f32 %v1038_v38, %v364_v37  ;;  %v366_v49 = vmax.f32 %v332_v39, 0.0  ;;  %p930_p5 = por %p929_p4, %p928_p3 }
 0x13c   :  { %v393_v50 = vmul.f32 %v1042_v43, %v349_v41  ;;  %v351_v51 = vmax.f32 %v294_v42, 0.0  ;;  %v409_v52 = vmul.f32 %v1042_v43, %v365_v44  ;;  %428 = vadd.xlane.f32.xlu1 %v427_v32  ;;  %v367_v30 = vmax.f32 %v334_v45, 0.0 }
 0x13d   :  { %v394_v53 = vmul.f32 %v1038_v38, %v350_v47  ;;  %v410_v54 = vmul.f32 %v1038_v38, %v366_v49  ;;  %v451_v55 = vadd.f32 %v407_v21, %v406_v19  ;;  %p931_p6 = pnand %p930_p5, %p924_p2 }
 0x13e   :  { %v395_v31 = vmul.f32 %v1042_v43, %v351_v51  ;;  %v411_v56 = vmul.f32 %v1042_v43, %v367_v30  ;;  %v430_v57 = vadd.f32 %v393_v50, %v392_v46  ;;  %v454_v58 = vadd.f32 %v409_v52, %v408_v48 }
 0x140   :  { %431 = vadd.xlane.f32.xlu0 %v430_v57  ;;  %v433_v59 = vadd.f32 %v395_v31, %v394_v53  ;;  %v457_v60 = vadd.f32 %v411_v56, %v410_v54  ;;  %v1125_v31 = vand.u32 127, %v85_v25 }
 0x142   :  { %434 = vadd.xlane.f32.xlu1 %v433_v59 }
 0x144   :  { %449 = vadd.xlane.f32.xlu0 %v448_v18 }
 0x146   :  { %452 = vadd.xlane.f32.xlu1 %v451_v55 }
 0x148   :  { %455 = vadd.xlane.f32.xlu0 %v454_v58 }
 0x14a   :  { %458 = vadd.xlane.f32.xlu1 %v457_v60 }
 0x1b5   :  { %v414_v38 = vpop.xlane.xlu0 %413 }
 0x1b6   :  { %v462_v62 = vadd.f32 %v1107_v61, %v414_v38 }
 0x1b7   :  { %v441_v63 = vpop.xlane.xlu1 %440 }
 0x1b8   :  { %v743_v0 = vmul.f32 -1.442695, %v462_v62  ;;  %v471_v10 = vadd.f32 %v1107_v61, %v441_v63  ;;  %v596_v62 = vadd.s32 4294967288, %v1125_v31 }
 0x1b9   :  { %v438_v43 = vpop.xlane.xlu0 %437 }
 0x1ba   :  { %815 = vpow2.f32 %v743_v0  ;;  %v470_v12 = vadd.f32 %v1107_v61, %v438_v43  ;;  %v752_v16 = vmul.f32 -1.442695, %v471_v10 }
 0x1bc   :  { %v751_v20 = vmul.f32 -1.442695, %v470_v12 }
 0x1bd   :  { %v420_v1 = vpop.xlane.xlu1 %419  ;;  %v417_v2 = vpop.xlane.xlu0 %416 }
 0x1be   :  { %v464_v3 = vadd.f32 %v1107_v61, %v420_v1  ;;  %v463_v4 = vadd.f32 %v1107_v61, %v417_v2 }
 0x1c0   :  { %v745_v5 = vmul.f32 -1.442695, %v464_v3  ;;  %v744_v6 = vmul.f32 -1.442695, %v463_v4  ;;  %v1130_v3 = vadd.s32 4294967224, %v1125_v31 }
 0x1c1   :  { %v423_v7 = vpop.xlane.xlu1 %422  ;;  %v444_v8 = vpop.xlane.xlu0 %443 }
 0x1c2   :  { %v465_v9 = vadd.f32 %v1107_v61, %v423_v7  ;;  %817 = vpow2.f32 %v744_v6  ;;  %v472_v18 = vadd.f32 %v1107_v61, %v444_v8  ;;  %v594_v6 = vsub.s32 %v1125_v31, %v1022_v26 }
 0x1c3   :  { %819 = vpow2.f32 %v745_v5  ;;  %v603_v5 = vadd.s32 4294967280, %v1125_v31  ;;  %v599_v7 = vsub.s32 %v596_v62, %v1022_v26  ;;  %v610_v8 = vadd.s32 4294967272, %v1125_v31 }
 0x1c4   :  { %v746_v11 = vmul.f32 -1.442695, %v465_v9  ;;  %v816_v17 = vpop.eup %815  ;;  %v753_v27 = vmul.f32 -1.442695, %v472_v18  ;;  %v687_v62 = vadd.s32 4294967184, %v1125_v31 }
 0x1c5   :  { %v447_v13 = vpop.xlane.xlu1 %446  ;;  %v426_v14 = vpop.xlane.xlu0 %425  ;;  %v526_v24 = vadd.f32 1.0, %v816_v17 }
 0x1c6   :  { %821 = vpow2.f32 %v746_v11  ;;  %v466_v15 = vadd.f32 %v1107_v61, %v426_v14  ;;  %v473_v21 = vadd.f32 %v1107_v61, %v447_v13  ;;  %v1138_v11 = vadd.s32 4294967232, %v1125_v31 }
 0x1c7   :  { %823 = vpow2.f32 %v752_v16  ;;  %v617_v13 = vadd.s32 4294967264, %v1125_v31  ;;  %v624_v16 = vadd.s32 4294967256, %v1125_v31 }
 0x1c8   :  { %v747_v19 = vmul.f32 -1.442695, %v466_v15  ;;  %v754_v32 = vmul.f32 -1.442695, %v473_v21 }
 0x1c9   :  { %v429_v22 = vpop.xlane.xlu1 %428 }
 0x1ca   :  { %v467_v23 = vadd.f32 %v1107_v61, %v429_v22  ;;  %825 = vpow2.f32 %v747_v19  ;;  %v655_v19 = vsub.s32 %v1130_v3, %v1022_v26 }
 0x1cb   :  { %827 = vpow2.f32 %v751_v20  ;;  %v606_v20 = vsub.s32 %v603_v5, %v1022_v26  ;;  %v694_v5 = vadd.s32 4294967176, %v1125_v31 }
 0x1cc   :  { %v748_v28 = vmul.f32 -1.442695, %v467_v23  ;;  %v818_v29 = vpop.eup %817  ;;  %v613_v23 = vsub.s32 %v610_v8, %v1022_v26 }
 0x1cd   :  { %v432_v33 = vpop.xlane.xlu0 %431  ;;  %v820_v34 = vpop.eup %819  ;;  %v527_v36 = vadd.f32 1.0, %v818_v29  ;;  %v631_v29 = vadd.s32 4294967248, %v1125_v31 }
 0x1ce   :  { %829 = vpow2.f32 %v748_v28  ;;  %v468_v35 = vadd.f32 %v1107_v61, %v432_v33  ;;  %v528_v42 = vadd.f32 1.0, %v820_v34  ;;  %v620_v28 = vsub.s32 %v617_v13, %v1022_v26 }
 0x1cf   :  { %831 = vrcp.f32 %v526_v24  ;;  %v435_v37 = vpop.xlane.xlu1 %434  ;;  %v627_v34 = vsub.s32 %v624_v16, %v1022_v26 }
 0x1d0   :  { %v822_v39 = vpop.eup %821  ;;  %833 = vpow2.f32 %v753_v27  ;;  %v749_v40 = vmul.f32 -1.442695, %v468_v35  ;;  %v469_v41 = vadd.f32 %v1107_v61, %v435_v37 }
 0x1d1   :  { %835 = vpow2.f32 %v754_v32  ;;  %v450_v44 = vpop.xlane.xlu0 %449  ;;  %v529_v47 = vadd.f32 1.0, %v822_v39  ;;  %v824_v51 = vpop.eup %823  ;;  %v638_v39 = vadd.s32 4294967240, %v1125_v31 }
 0x1d2   :  { %837 = vpow2.f32 %v749_v40  ;;  %v750_v45 = vmul.f32 -1.442695, %v469_v41  ;;  %v474_v46 = vadd.f32 %v1107_v61, %v450_v44  ;;  %v535_v0 = vadd.f32 1.0, %v824_v51 }
 0x1d3   :  { %839 = vrcp.f32 %v527_v36  ;;  %v453_v48 = vpop.xlane.xlu1 %452 }
 0x1d4   :  { %841 = vpow2.f32 %v750_v45  ;;  %v755_v49 = vmul.f32 -1.442695, %v474_v46  ;;  %v475_v50 = vadd.f32 %v1107_v61, %v453_v48  ;;  %v826_v30 = vpop.eup %825  ;;  %v659_v46 = vadd.s32 4294967216, %v1125_v31 }
 0x1d5   :  { %843 = vrcp.f32 %v528_v42  ;;  %v456_v52 = vpop.xlane.xlu0 %455  ;;  %v828_v55 = vpop.eup %827  ;;  %v530_v56 = vadd.f32 1.0, %v826_v30  ;;  %v648_v30 = vsub.s32 %v1138_v11, %v1022_v26 }
 0x1d6   :  { %845 = vpow2.f32 %v755_v49  ;;  %v756_v53 = vmul.f32 -1.442695, %v475_v50  ;;  %v476_v54 = vadd.f32 %v1107_v61, %v456_v52  ;;  %v534_v4 = vadd.f32 1.0, %v828_v55 }
 0x1d7   :  { %847 = vrcp.f32 %v529_v47  ;;  %v459_v57 = vpop.xlane.xlu1 %458  ;;  %v666_v47 = vadd.s32 4294967208, %v1125_v31  ;;  %v634_v49 = vsub.s32 %v631_v29, %v1022_v26 }
 0x1d8   :  { %v830_v58 = vpop.eup %829  ;;  %849 = vpow2.f32 %v756_v53  ;;  %v757_v59 = vmul.f32 -1.442695, %v476_v54  ;;  %v477_v60 = vadd.f32 %v1107_v61, %v459_v57  ;;  %v641_v54 = vsub.s32 %v638_v39, %v1022_v26 }
 0x1d9   :  { %v832_v38 = vpop.eup %831  ;;  %851 = vrcp.f32 %v530_v56  ;;  %v531_v63 = vadd.f32 1.0, %v830_v58  ;;  %v673_v57 = vadd.s32 4294967200, %v1125_v31 }
 0x1da   :  { %v834_v43 = vpop.eup %833  ;;  %853 = vpow2.f32 %v757_v59  ;;  %v758_v1 = vmul.f32 -1.442695, %v477_v60  ;;  %v595_v33 = vrot.slane %v832_v38, %v594_v6  ;;  %v680_v38 = vadd.s32 4294967192, %v1125_v31 }
 0x1db   :  { %v836_v2 = vpop.eup %835  ;;  %855 = vrcp.f32 %v531_v63  ;;  %v536_v12 = vadd.f32 1.0, %v834_v43  ;;  %v662_v43 = vsub.s32 %v659_v46, %v1022_v26 }
 0x1dc   :  { %v838_v25 = vpop.eup %837  ;;  %857 = vpow2.f32 %v758_v1  ;;  %v537_v15 = vadd.f32 1.0, %v836_v2  ;;  %v683_v11 = vsub.s32 %v680_v38, %v1022_v26 }
 0x1dd   :  { %v840_v61 = vpop.eup %839  ;;  %v532_v9 = vadd.f32 1.0, %v838_v25  ;;  %859 = vrcp.f32 %v535_v0  ;;  %v669_v0 = vsub.s32 %v666_v47, %v1022_v26 }
 0x1de   :  { %v842_v10 = vpop.eup %841  ;;  %v600_v22 = vrot.slane %v840_v61, %v599_v7  ;;  %v676_v7 = vsub.s32 %v673_v57, %v1022_v26 }
 0x1df   :  { %v844_v14 = vpop.eup %843  ;;  %861 = vrcp.f32 %v532_v9  ;;  %v533_v17 = vadd.f32 1.0, %v842_v10 }
 0x1e0   :  { %v846_v18 = vpop.eup %845  ;;  %863 = vrcp.f32 %v534_v4  ;;  %v607_v37 = vrot.slane %v844_v14, %v606_v20  ;;  %v602_v41 = vsel %vm601_vm0, %v600_v22, %v595_v33 }
 0x1e1   :  { %v848_v21 = vpop.eup %847  ;;  %865 = vrcp.f32 %v533_v17  ;;  %v538_v24 = vadd.f32 1.0, %v846_v18  ;;  %v697_v17 = vsub.s32 %v694_v5, %v1022_v26 }
 0x1e2   :  { %v850_v27 = vpop.eup %849  ;;  %867 = vrcp.f32 %v536_v12  ;;  %v614_v42 = vrot.slane %v848_v21, %v613_v23  ;;  %v609_v53 = vsel %vm608_vm1, %v607_v37, %v602_v41  ;;  %v690_v12 = vsub.s32 %v687_v62, %v1022_v26 }
 0x1e3   :  { %v852_v32 = vpop.eup %851  ;;  %869 = vrcp.f32 %v537_v15  ;;  %v539_v35 = vadd.f32 1.0, %v850_v27 }
 0x1e4   :  { %v854_v36 = vpop.eup %853  ;;  %871 = vrcp.f32 %v538_v24  ;;  %v621_v48 = vrot.slane %v852_v32, %v620_v28  ;;  %v616_v56 = vsel %vm615_vm2, %v614_v42, %v609_v53 }
 0x1e5   :  { %v856_v40 = vpop.eup %855  ;;  %873 = vrcp.f32 %v539_v35  ;;  %v540_v44 = vadd.f32 1.0, %v854_v36 }
 0x1e6   :  { %v858_v45 = vpop.eup %857  ;;  %v628_v50 = vrot.slane %v856_v40, %v627_v34  ;;  %v623_v59 = vsel %vm622_vm3, %v621_v48, %v616_v56 }
 0x1e7   :  { %875 = vrcp.f32 %v540_v44  ;;  %v541_v51 = vadd.f32 1.0, %v858_v45  ;;  %v860_v52 = vpop.eup %859 }
 0x1e8   :  { %v630_v1 = vsel %vm629_vm4, %v628_v50, %v623_v59  ;;  %v656_v9 = vrot.slane %v860_v52, %v655_v19 }
 0x1e9   :  { %v862_v55 = vpop.eup %861  ;;  %877 = vrcp.f32 %v541_v51 }
 0x1ea   :  { %v864_v58 = vpop.eup %863  ;;  %v635_v60 = vrot.slane %v862_v55, %v634_v49 }
 0x1eb   :  { %v866_v63 = vpop.eup %865  ;;  %v649_v6 = vrot.slane %v864_v58, %v648_v30 }
 0x1ec   :  { %v868_v2 = vpop.eup %867  ;;  %v637_v25 = vsel %vm636_vm5, %v635_v60, %v630_v1  ;;  %v642_v4 = vrot.slane %v866_v63, %v641_v54 }
 0x1ed   :  { %v870_v61 = vpop.eup %869  ;;  %v663_v14 = vrot.slane %v868_v2, %v662_v43 }
 0x1ee   :  { %v872_v8 = vpop.eup %871  ;;  %v644_v10 = vsel %vm643_vm6, %v642_v4, %v637_v25  ;;  %v670_v31 = vrot.slane %v870_v61, %v669_v0 }
 0x1ef   :  { %v874_v13 = vpop.eup %873  ;;  %v651_v15 = vsel %vm650_vm7, %v649_v6, %v644_v10  ;;  %v677_v21 = vrot.slane %v872_v8, %v676_v7 }
 0x1f0   :  { %v658_v16 = vsel %vm657_vm8, %v656_v9, %v651_v15  ;;  %v684_v19 = vrot.slane %v874_v13, %v683_v11 }
 0x1f1   :  { %v876_v18 = vpop.eup %875  ;;  %v665_v20 = vsel %vm664_vm9, %v663_v14, %v658_v16 }
 0x1f2   :  { %v672_v3 = vsel %vm671_vm10, %v670_v31, %v665_v20  ;;  %v691_v22 = vrot.slane %v876_v18, %v690_v12 }
 0x1f3   :  { %v878_v23 = vpop.eup %877  ;;  %v679_v24 = vsel %vm678_vm11, %v677_v21, %v672_v3 }
 0x1f4   :  { %v686_v27 = vsel %vm685_vm12, %v684_v19, %v679_v24  ;;  %v698_v28 = vrot.slane %v878_v23, %v697_v17 }
 0x1f5   :  { %v693_v29 = vsel %vm692_vm13, %v691_v22, %v686_v27 }
 0x1f6   :  { %v700_v32 = vsel %vm699_vm14, %v698_v28, %v693_v29 }
 0x1f7   :  { %702 = vst [vmem:[#allocation8] sm:$0x1] %v700_v32 }
 0x1f8   :  { %934 = shalt.err (!%p931_p6)
}
 0x1f9   :  { %s935_s29 = scalar_lea.hbm %s1190_s5, 16 }
 0x1fa   :  { %p936_p7 = scmp.ne.s32.totalorder %s1190_s5, %s935_s29  ;;  %p939_p8 = scmp.lt.u32.totalorder %s935_s29, %s1190_s5 }
 0x1fc   :  { %p941_p9 = pnand %p939_p8, %p936_p7 }
 0x1fe   :  { %944 = shalt.err (!%p941_p9)
}
 0x1ff   :  { %712 = dma.vmem_to_hbm [thread:$0]  %s710_s24, 16, %s1190_s5, [#allocation5]  }
 0x200   :  { %949 = dma.done.wait [#allocation5], 16  }
 0x201   :  { %950 = vsyncadd [#allocation5], 4294967280 }
 0x202   :  { %716 = vsyncpa [#allocation4], 1 }
 0x203   :  { %717 = vsyncpa [#allocation7], 1 }
 0x204   :  { %718 = vsyncpa [#allocation5], 1 }

</bundles_post_ra>
